<compile_context>
chip_gen: v6e
topology: v6e:2x2x1
jax: 0.10.0
libtpu: 0.0.40
codegen_flags: <defaults>
</compile_context>

<pallas_src>
import math
import functools

import jax
import jax.numpy as jnp
from jax import lax
from jax.experimental import pallas as pl
from jax.experimental.pallas import tpu as pltpu


def _vgnet_kernel(scale, layer_kinds, chunk, samples_ref, normals_ref, *refs):
    """Full MLP forward for one tile of points, feature-major (lane-dense N) layout.

    samples_ref, normals_ref : (d_in, tile_n)
    refs = [flat per-layer params ...] + [out_ref]
      kind 'first': (W_s_T, W_n_T, b)          W_*_T: (out, d_in),  b: (out, 1)
      kind 'skip' : (W_x_T, W_s_T, W_n_T, b)   W_x_T: (out, dim_x)
      kind 'plain': (W_T, b)                   W_T:   (out, in)
    out_ref : (d_out, tile_n)
    """
    out_ref = refs[-1]
    param_refs = refs[:-1]

    n_lin = len(layer_kinds)
    inv_scale = 1.0 / scale
    inv_sqrt2 = 1.0 / math.sqrt(2.0)
    tile_n = samples_ref.shape[-1]
    n_chunks = tile_n // chunk                          # static

    def f32dot(a, b):
        return jnp.dot(a, b, preferred_element_type=jnp.float32)

    def chunk_body(ci, carry):
        start = pl.multiple_of(ci * chunk, chunk)
        cols = pl.ds(start, chunk)
        s = samples_ref[:, cols]                        # (d_in, chunk)
        n = normals_ref[:, cols]                        # (d_in, chunk)
        ss = s * scale                                  # samples * self.scale

        x = None
        idx = 0
        for l, kind in enumerate(layer_kinds):
            if kind == "first":
                # lin0(cat([samples*scale, normals])) = W_s@ss + W_n@n + b
                w_s = param_refs[idx][...]
                w_n = param_refs[idx + 1][...]
                b = param_refs[idx + 2][...]
                idx += 3
                x = f32dot(w_s, ss) + f32dot(w_n, n) + b
            elif kind == "skip":
                # lin(cat([x, inputs]) / sqrt(2)) = (W_x@x + W_s@ss + W_n@n)/sqrt(2) + b
                w_x = param_refs[idx][...]
                w_s = param_refs[idx + 1][...]
                w_n = param_refs[idx + 2][...]
                b = param_refs[idx + 3][...]
                idx += 4
                x = (f32dot(w_x, x) + f32dot(w_s, ss) + f32dot(w_n, n)) * inv_sqrt2 + b
            else:
                w = param_refs[idx][...]
                b = param_refs[idx + 1][...]
                idx += 2
                x = f32dot(w, x) + b
            if l < n_lin - 1:
                x = jnp.maximum(x, 0.0)                 # ReLU on all but the last layer

        out_ref[:, cols] = s + x * inv_scale            # moving_pcd = samples + x / scale
        return carry

    lax.fori_loop(0, n_chunks, chunk_body, 0)


def _round_up(a, m):
    return ((a + m - 1) // m) * m


def vgnet_forward(samples, normals, params, *, scale=1.0, skip_in=(4,),
                  tile_n=8192, chunk=256, target_grid_steps=8):
    """samples, normals: (N, 3) f32.  params: list of (W, b) with W (in, out), b (1, out)."""
    N, d_in = samples.shape
    n_dim = normals.shape[1]
    n_lin = len(params)
    d_out = params[-1][0].shape[1]
    dims0 = params[0][0].shape[0]
    assert d_out == d_in, "moving_pcd = samples + x/scale requires d_out == d_in"
    assert dims0 == d_in + n_dim, "layer-0 input must be cat([samples*scale, normals])"
    assert chunk % 128 == 0, "chunk must be a multiple of 128 (256 preferred: v6e/v7x MXU)"
    skip = set(skip_in)
    assert 0 not in skip

    # Tile sizing: large to amortize ~0.35us/grid-step bookkeeping, capped so the grid
    # keeps >= target_grid_steps steps (occupies both v7x TensorCores). No padding: the
    # ragged last block is masked by Pallas on writeback.
    tn = min(_round_up(tile_n, chunk),
             max(chunk, _round_up(pl.cdiv(N, target_grid_steps), chunk)))
    grid_steps = pl.cdiv(N, tn)

    # Feature-major views only (point axis N lane-dense). No concat / pad / pre-scale here.
    samples_t = samples.T                                   # (d_in, N)
    normals_t = normals.T                                   # (n_dim, N)

    def layer_kind(l):
        if l == 0:
            return "first"
        if l in skip:
            return "skip"
        return "plain"

    layer_kinds = tuple(layer_kind(l) for l in range(n_lin))

    # Flatten params, pre-transposed to (out, in); split layer-0 / skip-layer weights so the
    # kernel never concatenates along a vreg dimension.
    flat_params = []
    in_specs = [
        pl.BlockSpec((d_in, tn), lambda i: (0, i)),         # samples_t, tiled over N
        pl.BlockSpec((n_dim, tn), lambda i: (0, i)),        # normals_t, tiled over N
    ]
    for l, (w, b) in enumerate(params):
        bt = jnp.reshape(b, (1, -1)).T                      # (out, 1)
        kind = layer_kinds[l]
        if kind == "first":
            layer_p = (w[:d_in, :].T, w[d_in:, :].T, bt)
        elif kind == "skip":
            dim_x = w.shape[0] - dims0
            layer_p = (w[:dim_x, :].T,
                       w[dim_x:dim_x + d_in, :].T,
                       w[dim_x + d_in:, :].T, bt)
        else:
            layer_p = (w.T, bt)
        for p in layer_p:
            flat_params.append(p)
            in_specs.append(pl.BlockSpec(p.shape, lambda i: (0, 0)))   # resident weights

    kernel = functools.partial(_vgnet_kernel, float(scale), layer_kinds, chunk)

    # Explicit VMEM budget from the actual footprint (double-buffered I/O + weights) plus
    # headroom for Mosaic scratch; stays far below v7x's 64 MiB physical VMEM.
    io_bytes = 2 * 4 * tn * (d_in + n_dim + d_out)
    w_bytes = 2 * 4 * sum(int(p.size) for p in flat_params)
    vmem_limit = min(io_bytes + w_bytes + (8 << 20), 48 << 20)

    out_t = pl.pallas_call(
        kernel,
        out_shape=jax.ShapeDtypeStruct((d_out, N), jnp.float32),
        grid_spec=pltpu.PrefetchScalarGridSpec(
            num_scalar_prefetch=0,
            grid=(grid_steps,),
            in_specs=in_specs,
            out_specs=pl.BlockSpec((d_out, tn), lambda i: (0, i)),
        ),
        compiler_params=pltpu.CompilerParams(
            dimension_semantics=("parallel",),              # tiles independent -> both TCs
            vmem_limit_bytes=int(vmem_limit),
        ),
    )(samples_t, normals_t, *flat_params)

    # Return (N, d_out) to match the PyTorch interface; consumers that can take the
    # feature-major (d_out, N) view directly should, to skip this transpose.
    return out_t.T


def init_vgnet_params(key, d_in, d_out, d_hidden, n_layers, skip_in):
    """Geometric init, multires=0 branch: W ~ N(0, sqrt(2)/sqrt(out)), b = 0.
    (Same distribution as the torch module; not bit-identical RNG draws.)"""
    dims = [d_in + 3] + [d_hidden] * n_layers + [d_out]     # dims[0] += 3 (normals)
    dims0 = dims[0]
    params = []
    for l in range(len(dims) - 1):
        out_dim = dims[l + 1] - dims0 if (l + 1) in skip_in else dims[l + 1]
        in_dim = dims[l]
        key, wk = jax.random.split(key)
        std = math.sqrt(2.0) / math.sqrt(out_dim)
        w = std * jax.random.normal(wk, (in_dim, out_dim), dtype=jnp.float32)
        b = jnp.zeros((1, out_dim), dtype=jnp.float32)
        params.append((w, b))
    return params


def vgnet_ref(samples, normals, params, *, scale=1.0, skip_in=(4,)):
    """Pure-JAX reference mirroring the PyTorch forward."""
    inputs = jnp.concatenate([samples * scale, normals], axis=-1)
    x = inputs
    n_lin = len(params)
    for l, (w, b) in enumerate(params):
        if l in skip_in:
            x = jnp.concatenate([x, inputs], axis=1) / math.sqrt(2.0)
        x = x @ w + b
        if l < n_lin - 1:
            x = jnp.maximum(x, 0.0)
    return samples + x / scale


# TODO(synk): multires>0 positional embedding and Hash_grid / Hash_triplane feature paths
# are not implemented (disabled in the default config this kernel targets).

if __name__ == "__main__":
    # Config consistent with the module: d_in=3, d_out=3, d_hidden=32, n_layers=4,
    # skip_in=(4,), scale=1 -> 5 linear layers, skip at layer 4.
    d_in, d_out, d_hidden, n_layers = 3, 3, 32, 4
    skip_in = (4,)
    scale = 1.0
    N = 1000          # deliberately NOT a multiple of chunk/tile: exercises ragged last block

    key = jax.random.PRNGKey(0)
    k_s, k_n, k_p = jax.random.split(key, 3)
    samples = jax.random.normal(k_s, (N, d_in), dtype=jnp.float32)
    normals = jax.random.normal(k_n, (N, d_in), dtype=jnp.float32)
    params = init_vgnet_params(k_p, d_in, d_out, d_hidden, n_layers, skip_in)

    out = vgnet_forward(samples, normals, params, scale=scale, skip_in=skip_in)
    out = jax.block_until_ready(out)

    ref = vgnet_ref(samples, normals, params, scale=scale, skip_in=skip_in)
    assert out.shape == (N, d_out)
    assert jnp.allclose(out, ref, atol=1e-3, rtol=1e-3)

    print("KERNEL_OK")
</pallas_src>

<mosaic_0001>
module attributes {stable_mosaic.version = 11 : i64} {
  func.func @_vgnet_kernel(%arg0: i32, %arg1: memref<3x256xf32, #tpu.memory_space<vmem>>, %arg2: memref<3x256xf32, #tpu.memory_space<vmem>>, %arg3: memref<32x3xf32, #tpu.memory_space<vmem>>, %arg4: memref<32x3xf32, #tpu.memory_space<vmem>>, %arg5: memref<32x1xf32, #tpu.memory_space<vmem>>, %arg6: memref<32x32xf32, #tpu.memory_space<vmem>>, %arg7: memref<32x1xf32, #tpu.memory_space<vmem>>, %arg8: memref<32x32xf32, #tpu.memory_space<vmem>>, %arg9: memref<32x1xf32, #tpu.memory_space<vmem>>, %arg10: memref<26x32xf32, #tpu.memory_space<vmem>>, %arg11: memref<26x1xf32, #tpu.memory_space<vmem>>, %arg12: memref<3x26xf32, #tpu.memory_space<vmem>>, %arg13: memref<3x3xf32, #tpu.memory_space<vmem>>, %arg14: memref<3x3xf32, #tpu.memory_space<vmem>>, %arg15: memref<3x1xf32, #tpu.memory_space<vmem>>, %arg16: memref<3x256xf32, #tpu.memory_space<vmem>>) attributes {dimension_semantics = [#tpu.dimension_semantics<parallel>], iteration_bounds = array<i64: 4>, scalar_prefetch = 0 : i64, scratch_operands = 0 : i64, tpu.core_type = #tpu.core_type<tc>, window_params = [{transform_indices = @transform_0, window_bounds = array<i64: 3, 256>}, {transform_indices = @transform_1, window_bounds = array<i64: 3, 256>}, {pipeline_mode = #tpu.pipeline_mode<synchronous>, transform_indices = @transform_2, window_bounds = array<i64: 32, 3>}, {pipeline_mode = #tpu.pipeline_mode<synchronous>, transform_indices = @transform_3, window_bounds = array<i64: 32, 3>}, {pipeline_mode = #tpu.pipeline_mode<synchronous>, transform_indices = @transform_4, window_bounds = array<i64: 32, 1>}, {pipeline_mode = #tpu.pipeline_mode<synchronous>, transform_indices = @transform_5, window_bounds = array<i64: 32, 32>}, {pipeline_mode = #tpu.pipeline_mode<synchronous>, transform_indices = @transform_6, window_bounds = array<i64: 32, 1>}, {pipeline_mode = #tpu.pipeline_mode<synchronous>, transform_indices = @transform_7, window_bounds = array<i64: 32, 32>}, {pipeline_mode = #tpu.pipeline_mode<synchronous>, transform_indices = @transform_8, window_bounds = array<i64: 32, 1>}, {pipeline_mode = #tpu.pipeline_mode<synchronous>, transform_indices = @transform_9, window_bounds = array<i64: 26, 32>}, {pipeline_mode = #tpu.pipeline_mode<synchronous>, transform_indices = @transform_10, window_bounds = array<i64: 26, 1>}, {pipeline_mode = #tpu.pipeline_mode<synchronous>, transform_indices = @transform_11, window_bounds = array<i64: 3, 26>}, {pipeline_mode = #tpu.pipeline_mode<synchronous>, transform_indices = @transform_12, window_bounds = array<i64: 3, 3>}, {pipeline_mode = #tpu.pipeline_mode<synchronous>, transform_indices = @transform_13, window_bounds = array<i64: 3, 3>}, {pipeline_mode = #tpu.pipeline_mode<synchronous>, transform_indices = @transform_14, window_bounds = array<i64: 3, 1>}, {transform_indices = @transform_15, window_bounds = array<i64: 3, 256>}]} {
    %c0_i32 = arith.constant 0 : i32
    %c256_i32 = arith.constant 256 : i32
    %0 = arith.muli %c0_i32, %c256_i32 : i32
    %1 = tpu.assume_multiple %0, 256 : i32
    %c0 = arith.constant 0 : index
    %2 = arith.index_cast %1 : i32 to index
    %3 = vector.load %arg1[%c0, %2] : memref<3x256xf32, #tpu.memory_space<vmem>>, vector<3x256xf32>
    %c0_0 = arith.constant 0 : index
    %4 = arith.index_cast %1 : i32 to index
    %5 = vector.load %arg2[%c0_0, %4] : memref<3x256xf32, #tpu.memory_space<vmem>>, vector<3x256xf32>
    %cst = arith.constant 1.000000e+00 : f32
    %6 = vector.broadcast %cst : f32 to vector<3x256xf32>
    %7 = arith.mulf %3, %6 : vector<3x256xf32>
    %c0_1 = arith.constant 0 : index
    %c0_2 = arith.constant 0 : index
    %8 = vector.load %arg3[%c0_1, %c0_2] : memref<32x3xf32, #tpu.memory_space<vmem>>, vector<32x3xf32>
    %c0_3 = arith.constant 0 : index
    %c0_4 = arith.constant 0 : index
    %9 = vector.load %arg4[%c0_3, %c0_4] : memref<32x3xf32, #tpu.memory_space<vmem>>, vector<32x3xf32>
    %c0_5 = arith.constant 0 : index
    %c0_6 = arith.constant 0 : index
    %10 = vector.load %arg5[%c0_5, %c0_6] : memref<32x1xf32, #tpu.memory_space<vmem>>, vector<32x1xf32>
    %cst_7 = arith.constant dense<0.000000e+00> : vector<32x256xf32>
    %11 = tpu.matmul %8, %7, %cst_7 {dimension_numbers = #tpu.dot_dimension_numbers<[1], [0], [0], [1], [0, 0, 1, 1], [], []>} : vector<32x3xf32>, vector<3x256xf32>, vector<32x256xf32> -> vector<32x256xf32>
    %cst_8 = arith.constant dense<0.000000e+00> : vector<32x256xf32>
    %12 = tpu.matmul %9, %5, %cst_8 {dimension_numbers = #tpu.dot_dimension_numbers<[1], [0], [0], [1], [0, 0, 1, 1], [], []>} : vector<32x3xf32>, vector<3x256xf32>, vector<32x256xf32> -> vector<32x256xf32>
    %13 = arith.addf %11, %12 : vector<32x256xf32>
    %14 = vector.broadcast %10 : vector<32x1xf32> to vector<32x256xf32>
    %15 = arith.addf %13, %14 : vector<32x256xf32>
    %cst_9 = arith.constant 0.000000e+00 : f32
    %16 = vector.broadcast %cst_9 : f32 to vector<32x256xf32>
    %17 = arith.maximumf %15, %16 : vector<32x256xf32>
    %c0_10 = arith.constant 0 : index
    %c0_11 = arith.constant 0 : index
    %18 = vector.load %arg6[%c0_10, %c0_11] : memref<32x32xf32, #tpu.memory_space<vmem>>, vector<32x32xf32>
    %c0_12 = arith.constant 0 : index
    %c0_13 = arith.constant 0 : index
    %19 = vector.load %arg7[%c0_12, %c0_13] : memref<32x1xf32, #tpu.memory_space<vmem>>, vector<32x1xf32>
    %cst_14 = arith.constant dense<0.000000e+00> : vector<32x256xf32>
    %20 = tpu.matmul %18, %17, %cst_14 {dimension_numbers = #tpu.dot_dimension_numbers<[1], [0], [0], [1], [0, 0, 1, 1], [], []>} : vector<32x32xf32>, vector<32x256xf32>, vector<32x256xf32> -> vector<32x256xf32>
    %21 = vector.broadcast %19 : vector<32x1xf32> to vector<32x256xf32>
    %22 = arith.addf %20, %21 : vector<32x256xf32>
    %cst_15 = arith.constant 0.000000e+00 : f32
    %23 = vector.broadcast %cst_15 : f32 to vector<32x256xf32>
    %24 = arith.maximumf %22, %23 : vector<32x256xf32>
    %c0_16 = arith.constant 0 : index
    %c0_17 = arith.constant 0 : index
    %25 = vector.load %arg8[%c0_16, %c0_17] : memref<32x32xf32, #tpu.memory_space<vmem>>, vector<32x32xf32>
    %c0_18 = arith.constant 0 : index
    %c0_19 = arith.constant 0 : index
    %26 = vector.load %arg9[%c0_18, %c0_19] : memref<32x1xf32, #tpu.memory_space<vmem>>, vector<32x1xf32>
    %cst_20 = arith.constant dense<0.000000e+00> : vector<32x256xf32>
    %27 = tpu.matmul %25, %24, %cst_20 {dimension_numbers = #tpu.dot_dimension_numbers<[1], [0], [0], [1], [0, 0, 1, 1], [], []>} : vector<32x32xf32>, vector<32x256xf32>, vector<32x256xf32> -> vector<32x256xf32>
    %28 = vector.broadcast %26 : vector<32x1xf32> to vector<32x256xf32>
    %29 = arith.addf %27, %28 : vector<32x256xf32>
    %cst_21 = arith.constant 0.000000e+00 : f32
    %30 = vector.broadcast %cst_21 : f32 to vector<32x256xf32>
    %31 = arith.maximumf %29, %30 : vector<32x256xf32>
    %c0_22 = arith.constant 0 : index
    %c0_23 = arith.constant 0 : index
    %32 = vector.load %arg10[%c0_22, %c0_23] : memref<26x32xf32, #tpu.memory_space<vmem>>, vector<26x32xf32>
    %c0_24 = arith.constant 0 : index
    %c0_25 = arith.constant 0 : index
    %33 = vector.load %arg11[%c0_24, %c0_25] : memref<26x1xf32, #tpu.memory_space<vmem>>, vector<26x1xf32>
    %cst_26 = arith.constant dense<0.000000e+00> : vector<26x256xf32>
    %34 = tpu.matmul %32, %31, %cst_26 {dimension_numbers = #tpu.dot_dimension_numbers<[1], [0], [0], [1], [0, 0, 1, 1], [], []>} : vector<26x32xf32>, vector<32x256xf32>, vector<26x256xf32> -> vector<26x256xf32>
    %35 = vector.broadcast %33 : vector<26x1xf32> to vector<26x256xf32>
    %36 = arith.addf %34, %35 : vector<26x256xf32>
    %cst_27 = arith.constant 0.000000e+00 : f32
    %37 = vector.broadcast %cst_27 : f32 to vector<26x256xf32>
    %38 = arith.maximumf %36, %37 : vector<26x256xf32>
    %c0_28 = arith.constant 0 : index
    %c0_29 = arith.constant 0 : index
    %39 = vector.load %arg12[%c0_28, %c0_29] : memref<3x26xf32, #tpu.memory_space<vmem>>, vector<3x26xf32>
    %c0_30 = arith.constant 0 : index
    %c0_31 = arith.constant 0 : index
    %40 = vector.load %arg13[%c0_30, %c0_31] : memref<3x3xf32, #tpu.memory_space<vmem>>, vector<3x3xf32>
    %c0_32 = arith.constant 0 : index
    %c0_33 = arith.constant 0 : index
    %41 = vector.load %arg14[%c0_32, %c0_33] : memref<3x3xf32, #tpu.memory_space<vmem>>, vector<3x3xf32>
    %c0_34 = arith.constant 0 : index
    %c0_35 = arith.constant 0 : index
    %42 = vector.load %arg15[%c0_34, %c0_35] : memref<3x1xf32, #tpu.memory_space<vmem>>, vector<3x1xf32>
    %cst_36 = arith.constant dense<0.000000e+00> : vector<3x256xf32>
    %43 = tpu.matmul %39, %38, %cst_36 {dimension_numbers = #tpu.dot_dimension_numbers<[1], [0], [0], [1], [0, 0, 1, 1], [], []>} : vector<3x26xf32>, vector<26x256xf32>, vector<3x256xf32> -> vector<3x256xf32>
    %cst_37 = arith.constant dense<0.000000e+00> : vector<3x256xf32>
    %44 = tpu.matmul %40, %7, %cst_37 {dimension_numbers = #tpu.dot_dimension_numbers<[1], [0], [0], [1], [0, 0, 1, 1], [], []>} : vector<3x3xf32>, vector<3x256xf32>, vector<3x256xf32> -> vector<3x256xf32>
    %45 = arith.addf %43, %44 : vector<3x256xf32>
    %cst_38 = arith.constant dense<0.000000e+00> : vector<3x256xf32>
    %46 = tpu.matmul %41, %5, %cst_38 {dimension_numbers = #tpu.dot_dimension_numbers<[1], [0], [0], [1], [0, 0, 1, 1], [], []>} : vector<3x3xf32>, vector<3x256xf32>, vector<3x256xf32> -> vector<3x256xf32>
    %47 = arith.addf %45, %46 : vector<3x256xf32>
    %cst_39 = arith.constant 0.707106769 : f32
    %48 = vector.broadcast %cst_39 : f32 to vector<3x256xf32>
    %49 = arith.mulf %47, %48 : vector<3x256xf32>
    %50 = vector.broadcast %42 : vector<3x1xf32> to vector<3x256xf32>
    %51 = arith.addf %49, %50 : vector<3x256xf32>
    %cst_40 = arith.constant 1.000000e+00 : f32
    %52 = vector.broadcast %cst_40 : f32 to vector<3x256xf32>
    %53 = arith.mulf %51, %52 : vector<3x256xf32>
    %54 = arith.addf %3, %53 : vector<3x256xf32>
    %c0_41 = arith.constant 0 : index
    %55 = arith.index_cast %1 : i32 to index
    %56 = vector.load %arg16[%c0_41, %55] : memref<3x256xf32, #tpu.memory_space<vmem>>, vector<3x256xf32>
    tpu.vector_store %arg16[%c0_41, %55], %54 {strides = array<i32>} : memref<3x256xf32, #tpu.memory_space<vmem>>, vector<3x256xf32>,
    %c1_i32 = arith.constant 1 : i32
    return
  }
  func.func @transform_0(%arg0: i32) -> (i32, i32) {
    %c0_i32 = arith.constant 0 : i32
    %c0_i32_0 = arith.constant 0 : i32
    return %c0_i32, %arg0 : i32, i32
  }
  func.func @transform_1(%arg0: i32) -> (i32, i32) {
    %c0_i32 = arith.constant 0 : i32
    %c0_i32_0 = arith.constant 0 : i32
    return %c0_i32, %arg0 : i32, i32
  }
  func.func @transform_2(%arg0: i32) -> (i32, i32) {
    %c0_i32 = arith.constant 0 : i32
    %c0_i32_0 = arith.constant 0 : i32
    %c0_i32_1 = arith.constant 0 : i32
    return %c0_i32, %c0_i32_0 : i32, i32
  }
  func.func @transform_3(%arg0: i32) -> (i32, i32) {
    %c0_i32 = arith.constant 0 : i32
    %c0_i32_0 = arith.constant 0 : i32
    %c0_i32_1 = arith.constant 0 : i32
    return %c0_i32, %c0_i32_0 : i32, i32
  }
  func.func @transform_4(%arg0: i32) -> (i32, i32) {
    %c0_i32 = arith.constant 0 : i32
    %c0_i32_0 = arith.constant 0 : i32
    %c0_i32_1 = arith.constant 0 : i32
    return %c0_i32, %c0_i32_0 : i32, i32
  }
  func.func @transform_5(%arg0: i32) -> (i32, i32) {
    %c0_i32 = arith.constant 0 : i32
    %c0_i32_0 = arith.constant 0 : i32
    %c0_i32_1 = arith.constant 0 : i32
    return %c0_i32, %c0_i32_0 : i32, i32
  }
  func.func @transform_6(%arg0: i32) -> (i32, i32) {
    %c0_i32 = arith.constant 0 : i32
    %c0_i32_0 = arith.constant 0 : i32
    %c0_i32_1 = arith.constant 0 : i32
    return %c0_i32, %c0_i32_0 : i32, i32
  }
  func.func @transform_7(%arg0: i32) -> (i32, i32) {
    %c0_i32 = arith.constant 0 : i32
    %c0_i32_0 = arith.constant 0 : i32
    %c0_i32_1 = arith.constant 0 : i32
    return %c0_i32, %c0_i32_0 : i32, i32
  }
  func.func @transform_8(%arg0: i32) -> (i32, i32) {
    %c0_i32 = arith.constant 0 : i32
    %c0_i32_0 = arith.constant 0 : i32
    %c0_i32_1 = arith.constant 0 : i32
    return %c0_i32, %c0_i32_0 : i32, i32
  }
  func.func @transform_9(%arg0: i32) -> (i32, i32) {
    %c0_i32 = arith.constant 0 : i32
    %c0_i32_0 = arith.constant 0 : i32
    %c0_i32_1 = arith.constant 0 : i32
    return %c0_i32, %c0_i32_0 : i32, i32
  }
  func.func @transform_10(%arg0: i32) -> (i32, i32) {
    %c0_i32 = arith.constant 0 : i32
    %c0_i32_0 = arith.constant 0 : i32
    %c0_i32_1 = arith.constant 0 : i32
    return %c0_i32, %c0_i32_0 : i32, i32
  }
  func.func @transform_11(%arg0: i32) -> (i32, i32) {
    %c0_i32 = arith.constant 0 : i32
    %c0_i32_0 = arith.constant 0 : i32
    %c0_i32_1 = arith.constant 0 : i32
    return %c0_i32, %c0_i32_0 : i32, i32
  }
  func.func @transform_12(%arg0: i32) -> (i32, i32) {
    %c0_i32 = arith.constant 0 : i32
    %c0_i32_0 = arith.constant 0 : i32
    %c0_i32_1 = arith.constant 0 : i32
    return %c0_i32, %c0_i32_0 : i32, i32
  }
  func.func @transform_13(%arg0: i32) -> (i32, i32) {
    %c0_i32 = arith.constant 0 : i32
    %c0_i32_0 = arith.constant 0 : i32
    %c0_i32_1 = arith.constant 0 : i32
    return %c0_i32, %c0_i32_0 : i32, i32
  }
  func.func @transform_14(%arg0: i32) -> (i32, i32) {
    %c0_i32 = arith.constant 0 : i32
    %c0_i32_0 = arith.constant 0 : i32
    %c0_i32_1 = arith.constant 0 : i32
    return %c0_i32, %c0_i32_0 : i32, i32
  }
  func.func @transform_15(%arg0: i32) -> (i32, i32) {
    %c0_i32 = arith.constant 0 : i32
    %c0_i32_0 = arith.constant 0 : i32
    return %c0_i32, %arg0 : i32, i32
  }
}

</mosaic_0001>

<bundles_post_ra>
// kernel: tpu_custom_call.1
= control target key start
LH: loop header
LB: loop body
LE: loop exit
PB: predicated region body
PF: predicated region fallthrough
CT: control target
= control target key end

     0   :  { %s2054_s0 = inlined_call_operand.vmem [shape: f32[3,1000], index: 0, kind: input, shape index: {}]   ;;  %s2055_s1 = inlined_call_operand.vmem [shape: f32[3,1000], index: 1, kind: input, shape index: {}]   ;;  %s2056_s2 = inlined_call_operand.vmem [shape: f32[32,3], index: 2, kind: input, shape index: {}]   ;;  %s2057_s3 = inlined_call_operand.vmem [shape: f32[32,3], index: 3, kind: input, shape index: {}]   ;;  %s2058_s4 = inlined_call_operand.vmem [shape: f32[32,1], index: 4, kind: input, shape index: {}]   ;;  %s2059_s5 = inlined_call_operand.vmem [shape: f32[32,32], index: 5, kind: input, shape index: {}]   ;;  %s2060_s6 = inlined_call_operand.vmem [shape: f32[32,1], index: 6, kind: input, shape index: {}]   ;;  %s2061_s7 = inlined_call_operand.vmem [shape: f32[32,32], index: 7, kind: input, shape index: {}]   ;;  %s2062_s8 = inlined_call_operand.vmem [shape: f32[32,1], index: 8, kind: input, shape index: {}]   ;;  %s2063_s9 = inlined_call_operand.vmem [shape: f32[26,32], index: 9, kind: input, shape index: {}]   ;;  %s2064_s10 = inlined_call_operand.vmem [shape: f32[26,1], index: 10, kind: input, shape index: {}]   ;;  %s2065_s11 = inlined_call_operand.vmem [shape: f32[3,26], index: 11, kind: input, shape index: {}]   ;;  %s2066_s12 = inlined_call_operand.vmem [shape: f32[3,3], index: 12, kind: input, shape index: {}]   ;;  %s2067_s13 = inlined_call_operand.vmem [shape: f32[3,3], index: 13, kind: input, shape index: {}]   ;;  %s2068_s14 = inlined_call_operand.vmem [shape: f32[3,1], index: 14, kind: input, shape index: {}]   ;;  %s2069_s15 = inlined_call_operand.hbm [shape: f32[3,1000], index: 15, kind: output, shape index: {}]  }
   0x1   :  { %2079 = sst [smem:[#allocation12_spill]] %s2069_s15 }
   0x2   :  { %20 = vsyncpa [#allocation3], 0 }
   0x3   :  { %22 = vsyncpa [#allocation3 + $0x1], 0  ;;  %s1771_s18 = smov 0   ;;  %s1773_s19 = smov 0  }
   0x4   :  { %s1775_s20 = smov 0   ;;  %s1777_s21 = smov 0  }
   0x5 LB: > { %2080 = sst [smem:[#allocation5_spill]] %s1674_s18  ;;  %s1792_s22 = sadd.s32 4294967295, %s1686_s21   ;;  %s1686_s21 = sphi %s1777_s21, %s2094_s21   ;;  %s1682_s20 = sphi %s1775_s20, %s2096_s20   ;;  %s1678_s19 = sphi %s1773_s19, %s2098_s19   ;;  %s1674_s18 = sphi %s1771_s18, %s2097_s18  }
   0x6   : > { %2081 = sst [smem:[#allocation6_spill]] %s1682_s20  ;;  %s1533_s23 = sadd.s32 4294967294, %s1686_s21  }
   0x7   : > { %2082 = sst [smem:[#allocation7_spill]] %s1686_s21  ;;  %s1796_s24 = sadd.s32 1, %s1686_s21  }
   0x8   : > { %2083 = sst [smem:[#allocation8_spill]] %s1796_s24  ;;  %s360_s25 = sadd.s32 1, %s1682_s20 }
   0x9   : > { %s357_s26 = ssub.s32 %s1686_s21, %s1796_s24  ;;  %p370_p0 = scmp.ne.s32.totalorder %s1682_s20, %s1678_s19 }
   0xa   : > { %p358_p1 = scmp.eq.s32.totalorder %s357_s26, 0  ;;  %p371_p2 = scmp.eq.s32.totalorder %s1792_s22, 3 }
   0xb   : > { %p376_p3 = scmp.ne.s32.totalorder %s1678_s19, %s1674_s18  ;;  %p377_p4 = scmp.eq.s32.totalorder %s1533_s23, 3 }
   0xc   : > { %s1807_s27 = scalar_select %p358_p1, %s1682_s20, %s360_s25  }
   0xd   : > { %p1809_p5 = por %p371_p2, %p370_p0  ;;  %p1813_p6 = por %p377_p4, %p376_p3 }
   0xe   : > { %2084 = sst [smem:[#allocation9_spill]] %s1807_s27  ;;  %p1536_p7 = scmp.ge.s32.totalorder %s1686_s21, 1 }
   0xf   : > { %s2085_s28 = scalar_select %p1809_p5, 1, 0 }
  0x10   : > { %s2087_s29 = scalar_select %p1813_p6, 1, 0 }
  0x11   : > { %2086 = sst [smem:[#allocation10_spill]] %s2085_s28  ;;  %p452_p8 = scmp.lt.s32.totalorder %s1686_s21, 5 }
  0x12   : > { %2088 = sst [smem:[#allocation11_spill]] %s2087_s29 }
  0x13   : > { %p453_p9 = pnand %p1536_p7, %p452_p8 }
  0x14   : > { %s1538_s30 = sshll.u32 (!%p453_p9), %s1792_s22, 1  ;;  %s502_s21 = sand.u32 (!%p453_p9), 1, %s1678_s19  }
  0x15   : > { %456 = sbr.rel (%p453_p9) target bundleno = 1136 (0x470), region = 80  ;;  %p506_p10 = scmp.lt.s32.totalorder (!%p453_p9), %s1538_s30, 7 }
  0x16   : > { %s1580_s27 = sshll.u32 (!%p453_p9), %s1792_s22, 7  ;;  %s2090_s25 = sld [smem:[#allocation12_spill]] (!%p453_p9) }
  0x17   : > { %s1690_s15 = smov (!%p453_p9), [#allocation2]  }
  0x18   : > { %s1630_s20 = sshll.u32 (!%p453_p9), %s1690_s15, 4  ;;  %s1631_s20 = int_to_ptr.vmem [resolvable:$false] %s1630_s20 }
  0x19   : > { %s1632_s22 = scalar_lea.vmem (!%p453_p9), %s1631_s20, 256 }
  0x1a   : > { %v1688_v0 = vmov 0.0   ;;  %v1689_v1 = vmov 0   ;;  %s2100_s30 = smov (!%p506_p10, %s1538_s30), 7  ;;  %v531_v2 = vld [vmem:[%s2058_s4 + $0x18] sm:$0xff]  ;;  %v529_v3 = vld [vmem:[%s2058_s4 + $0x8] sm:$0xff]  ;;  %v530_v4 = vld [vmem:[%s2058_s4 + $0x10] sm:$0xff] }
  0x1b   : > { %616 = vmatprep.mubr.f32.mxu0 %v1688_v0  ;;  %723 = vmatprep.mubr.f32.mxu1 %v1688_v0  ;;  %s1539_s26 = sshll.u32 %s2100_s30, 2  ;;  %v528_v5 = vld [vmem:[%s2058_s4] sm:$0xff]  ;;  %vm547_vm0 = vcmask 1042432   ;;  %vm534_vm1 = vcmask 23552   ;;  %v791_v12 = vld [vmem:[%s2060_s6 + $0x18] sm:$0xff]  ;;  %v790_v13 = vld [vmem:[%s2060_s6 + $0x10] sm:$0xff] }
  0x1c   : > { %1622 = vset.pattern.permute.xlu0 %v1689_v1  ;;  %1623 = vset.pattern.permute.xlu1 %v1689_v1  ;;  %s515_s18 = scalar_lea.vmem %s2055_s1, %s1539_s26  ;;  %s509_s16 = scalar_lea.vmem %s2054_s0, %s1539_s26  ;;  %v524_v10 = vld [vmem:[%s2057_s3] sm:$0xff]  ;;  %v525_v14 = vld [vmem:[%s2057_s3 + $0x8] sm:$0xff]  ;;  %v526_v18 = vld [vmem:[%s2057_s3 + $0x10] sm:$0xff]  ;;  %vm812_vm2 = vcmask 261120   ;;  %vm1278_vm3 = vcmask 1041408   ;;  %vm1274_vm4 = vcmask 211968  }
  0x1d   : > { %765 = vperm.xlu0 %1622, %v531_v2   ;;  %755 = vperm.xlu1 %1623, %v529_v3   ;;  %v1840_v6 = vld [vmem:[%s515_s18] sm:$0x77]  ;;  %v521_v15 = vld [vmem:[%s2056_s2 + $0x8] sm:$0xff]  ;;  %v522_v19 = vld [vmem:[%s2056_s2 + $0x10] sm:$0xff]  ;;  %s1537_s18 = sshll.u32 %s502_s21, 3  ;;  %s1460_s26 = scalar_lea.hbm %s2090_s25, %s1580_s27 }
  0x1e   : > { %v1842_v7 = vld [vmem:[%s509_s16] sm:$0x77]  ;;  %v1846_v8 = vcombine.high %v1840_v6, %v1840_v6  ;;  %v789_v16 = vld [vmem:[%s2060_s6 + $0x8] sm:$0xff]  ;;  %v929_v20 = vld [vmem:[%s2062_s8 + $0x18] sm:$0xff]  ;;  %s504_s28 = scalar_lea.vmem [#allocation2], %s1537_s18  ;;  %s1448_s16 = scalar_lea.sflag [#allocation3], %s502_s21 }
  0x1f   : > { %v1850_v9 = vcombine.high %v1842_v7, %v1842_v7  ;;  %v520_v11 = vld [vmem:[%s2056_s2] sm:$0xff]  ;;  %v928_v21 = vld [vmem:[%s2062_s8 + $0x10] sm:$0xff]  ;;  %v527_v22 = vld [vmem:[%s2057_s3 + $0x18] sm:$0xff]  ;;  %s1462_s29 = sshll.u32 %s504_s28, 4  ;;  %s1463_s29 = int_to_ptr.vmem [resolvable:$true] %s1462_s29 }
  0x20   : > { %1542 = vmatprep.subr.msk.mxu0 %vm547_vm0, %v1846_v8  ;;  %v788_v17 = vld [vmem:[%s2060_s6] sm:$0xff]  ;;  %v523_v23 = vld [vmem:[%s2056_s2 + $0x18] sm:$0xff]  ;;  %v927_v24 = vld [vmem:[%s2062_s8 + $0x8] sm:$0xff]  ;;  %s1626_s17 = scalar_lea.vmem %s1463_s29, 128  ;;  %p1633_p0 = scmp.lt.s32.totalorder %s1463_s29, %s1631_s20 }
  0x21   : > { %760 = vperm.xlu0 %1622, %v530_v4   ;;  %750 = vperm.xlu1 %1623, %v528_v5   ;;  %v926_v25 = vld [vmem:[%s2062_s8] sm:$0xff]  ;;  %v1066_v26 = vld [vmem:[%s2064_s10 + $0x18] sm:$0x3]  ;;  %v1065_v27 = vld [vmem:[%s2064_s10 + $0x10] sm:$0xff]  ;;  %p1627_p11 = scmp.ne.s32.totalorder %s1463_s29, %s1626_s17  ;;  %p1634_p1 = scmp.lt.s32.totalorder %s1632_s22, %s1626_s17 }
  0x22   : > { %1548 = vmatprep.subr.msk.mxu1 %vm547_vm0, %v1850_v9  ;;  %1543 = vmatpush1.msk.msra.mxu0 %vm547_vm0, %v1840_v6  ;;  %v1064_v28 = vld [vmem:[%s2064_s10 + $0x8] sm:$0xff]  ;;  %v1063_v29 = vld [vmem:[%s2064_s10] sm:$0xff] }
  0x23   : > { %1549 = vmatpush1.msk.msra.mxu1 %vm547_vm0, %v1842_v7  ;;  %1544 = vmatmul.mubr.msk.f32.vlgmr.msra.gmra.mxu0 %vm534_vm1, %v524_v10  ;;  %v1199_v30 = vld [vmem:[%s2068_s14] sm:$0x7]  ;;  %p1628_p12 = pnand %p1627_p11, %p1809_p5  ;;  %p1635_p2 = por %p1634_p1, %p1633_p0 }
  0x24   : > { %1550 = vmatmul.mubr.msk.f32.vlgmr.msra.gmra.mxu1 %vm534_vm1, %v520_v11  ;;  %622 = vmatprep.mubr.f32.mxu0 %v1688_v0 }
  0x25   : > { %729 = vmatprep.mubr.f32.mxu1 %v1688_v0  ;;  %809 = vperm.xlu0 %1622, %v791_v12   ;;  %p1629_p13 = pneg %p1628_p12 }
  0x26   : > { %804 = vperm.xlu1 %1623, %v790_v13  }
  0x27   : > { %1545 = vmatmul.mubr.msk.f32.gmra.mxu0 %vm534_vm1, %v525_v14  ;;  %p1636_p3 = pnand %p1635_p2, %p1629_p13 }
  0x28   : > { %1551 = vmatmul.mubr.msk.f32.gmra.mxu1 %vm534_vm1, %v521_v15  ;;  %628 = vmatprep.mubr.f32.mxu0 %v1688_v0 }
  0x29   : > { %735 = vmatprep.mubr.f32.mxu1 %v1688_v0  ;;  %799 = vperm.xlu0 %1622, %v789_v16   ;;  %v784_v16 = vld [vmem:[%s2059_s5] sm:$0xff] }
  0x2a   : > { %794 = vperm.xlu1 %1623, %v788_v17   ;;  %v785_v17 = vld [vmem:[%s2059_s5 + $0x8] sm:$0xff] }
  0x2b   : > { %1546 = vmatmul.mubr.msk.f32.gmra.mxu0 %vm534_vm1, %v526_v18  ;;  %v786_v18 = vld [vmem:[%s2059_s5 + $0x10] sm:$0xff] }
  0x2c   : > { %1552 = vmatmul.mubr.msk.f32.gmra.mxu1 %vm534_vm1, %v522_v19  ;;  %634 = vmatprep.mubr.f32.mxu0 %v1688_v0  ;;  %v787_v19 = vld [vmem:[%s2059_s5 + $0x18] sm:$0xff] }
  0x2d   : > { %741 = vmatprep.mubr.f32.mxu1 %v1688_v0  ;;  %947 = vperm.xlu0 %1622, %v929_v20  }
  0x2e   : > { %942 = vperm.xlu1 %1623, %v928_v21  }
  0x2f   : > { %1547 = vmatmul.mubr.msk.f32.gmra.mxu0 %vm534_vm1, %v527_v22 }
  0x30   : > { %1553 = vmatmul.mubr.msk.f32.gmra.mxu1 %vm534_vm1, %v523_v23  ;;  %889 = vmatprep.mubr.f32.mxu0 %v1688_v0 }
  0x31   : > { %1026 = vmatprep.mubr.f32.mxu1 %v1688_v0  ;;  %937 = vperm.xlu0 %1622, %v927_v24  }
  0x32   : > { %932 = vperm.xlu1 %1623, %v926_v25  }
  0x35   : > { %1084 = vperm.xlu0 %1622, %v1066_v26  }
  0x36   : > { %1079 = vperm.xlu1 %1623, %v1065_v27  }
  0x39   : > { %1074 = vperm.xlu0 %1622, %v1064_v28  }
  0x3a   : > { %1069 = vperm.xlu1 %1623, %v1063_v29  }
  0x3d   : > { %1436 = vperm.xlu0 %1622, %v1199_v30  }
  0x98   : > { %v766_v41 = vpop.permute.xlu0 %765  ;;  %v756_v46 = vpop.permute.xlu1 %755 }
  0x9c   : > { %v761_v54 = vpop.permute.xlu0 %760  ;;  %v751_v1 = vpop.permute.xlu1 %750 }
  0xa0   : > { %v810_v25 = vpop.permute.xlu0 %809 }
  0xa1   : > { %v805_v27 = vpop.permute.xlu1 %804 }
  0xe3   : > { %v618_v31 = vpop.f32.mrf.mxu0 }
  0xe4   : > { %v725_v32 = vpop.f32.mrf.mxu1 }
  0xe5   : > { %v620_v33 = vpop.f32.mrf.mxu0  ;;  %v726_v60 = vadd.f32 %v725_v32, %v618_v31 }
  0xe6   : > { %v727_v34 = vpop.f32.mrf.mxu1 }
  0xe7   : > { %v624_v35 = vpop.f32.mrf.mxu0  ;;  %v728_v57 = vadd.f32 %v727_v34, %v620_v33  ;;  %v768_v10 = vadd.f32 %v751_v1, %v726_v60  ;;  %v800_v33 = vpop.permute.xlu0 %799 }
  0xe8   : > { %v731_v36 = vpop.f32.mrf.mxu1 }
  0xe9   : > { %v626_v37 = vpop.f32.mrf.mxu0  ;;  %v732_v55 = vadd.f32 %v731_v36, %v624_v35  ;;  %v769_v4 = vadd.f32 %v751_v1, %v728_v57  ;;  %v776_v15 = vmax.f32 %v768_v10, 0.0 }
  0xea   : > { %v733_v38 = vpop.f32.mrf.mxu1 }
  0xeb   : > { %v630_v39 = vpop.f32.mrf.mxu0  ;;  %v734_v52 = vadd.f32 %v733_v38, %v626_v37  ;;  %v770_v2 = vadd.f32 %v756_v46, %v732_v55  ;;  %v777_v14 = vmax.f32 %v769_v4, 0.0  ;;  %v795_v37 = vpop.permute.xlu1 %794 }
  0xec   : > { %v737_v40 = vpop.f32.mrf.mxu1 }
  0xed   : > { %v632_v42 = vpop.f32.mrf.mxu0  ;;  %v738_v49 = vadd.f32 %v737_v40, %v630_v39  ;;  %v771_v62 = vadd.f32 %v756_v46, %v734_v52  ;;  %v778_v13 = vmax.f32 %v770_v2, 0.0 }
  0xee   : > { %v739_v43 = vpop.f32.mrf.mxu1 }
  0xef   : > { %v636_v44 = vpop.f32.mrf.mxu0  ;;  %v740_v47 = vadd.f32 %v739_v43, %v632_v42  ;;  %v772_v61 = vadd.f32 %v761_v54, %v738_v49  ;;  %v779_v12 = vmax.f32 %v771_v62, 0.0  ;;  %v923_v49 = vld [vmem:[%s2061_s7 + $0x8] sm:$0xff] }
  0xf0   : > { %v743_v45 = vpop.f32.mrf.mxu1 }
  0xf1   : > { %v744_v48 = vadd.f32 %v743_v45, %v636_v44  ;;  %v638_v50 = vpop.f32.mrf.mxu0  ;;  %v773_v58 = vadd.f32 %v761_v54, %v740_v47  ;;  %v780_v11 = vmax.f32 %v772_v61, 0.0 }
  0xf2   : > { %v745_v51 = vpop.f32.mrf.mxu1 }
  0xf3   : > { %v746_v53 = vadd.f32 %v745_v51, %v638_v50  ;;  %v774_v56 = vadd.f32 %v766_v41, %v744_v48  ;;  %v781_v5 = vmax.f32 %v773_v58, 0.0  ;;  %v922_v48 = vld [vmem:[%s2061_s7] sm:$0xff]  ;;  %v924_v50 = vld [vmem:[%s2061_s7 + $0x10] sm:$0xff]  ;;  %v943_v58 = vpop.permute.xlu1 %942 }
  0xf5   : > { %v775_v59 = vadd.f32 %v766_v41, %v746_v53  ;;  %v782_v3 = vmax.f32 %v774_v56, 0.0  ;;  %v948_v56 = vpop.permute.xlu0 %947 }
  0xf7   : > { %v783_v63 = vmax.f32 %v775_v59, 0.0 }
  0xf9   : > { %849 = vmatprep.subr.mxu0 %v783_v63  ;;  %v938_v1 = vpop.permute.xlu0 %937 }
  0xfa   : > { %850 = vmatpush1.msra.mxu0 %v782_v3 }
  0xfb   : > { %851 = vmatprep.subr.mxu0 %v781_v5  ;;  %v933_v5 = vpop.permute.xlu1 %932 }
  0xfc   : > { %852 = vmatpush1.msra.mxu0 %v780_v11 }
  0xfd   : > { %853 = vmatprep.subr.mxu0 %v779_v12 }
  0xfe   : > { %854 = vmatpush1.msra.mxu0 %v778_v13 }
  0xff   : > { %855 = vmatprep.subr.mxu0 %v777_v14 }
 0x100   : > { %856 = vmatpush1.msra.mxu0 %v776_v15 }
 0x101   : > { %1554 = vmatmul.mubr.msk.f32.vlgmr.msra.gmra.mxu0 %vm812_vm2, %v784_v16 }
 0x102   : > { %895 = vmatprep.mubr.f32.mxu0 %v1688_v0 }
 0x105   : > { %1555 = vmatmul.mubr.msk.f32.gmra.mxu0 %vm812_vm2, %v785_v17 }
 0x106   : > { %901 = vmatprep.mubr.f32.mxu0 %v1688_v0 }
 0x109   : > { %1556 = vmatmul.mubr.msk.f32.gmra.mxu0 %vm812_vm2, %v786_v18 }
 0x10a   : > { %907 = vmatprep.mubr.f32.mxu0 %v1688_v0 }
 0x10d   : > { %1557 = vmatmul.mubr.msk.f32.gmra.mxu0 %vm812_vm2, %v787_v19 }
 0x10e   : > { %1163 = vmatprep.mubr.f32.mxu0 %v1688_v0 }
 0x1c1   : > { %v891_v20 = vpop.f32.mrf.mxu0 }
 0x1c2   : > { %v892_v42 = vadd.f32 %v891_v20, %v795_v37  ;;  %v1059_v20 = vld [vmem:[%s2063_s9] sm:$0xff] }
 0x1c3   : > { %v893_v21 = vpop.f32.mrf.mxu0 }
 0x1c4   : > { %v894_v40 = vadd.f32 %v893_v21, %v795_v37  ;;  %v914_v47 = vmax.f32 %v892_v42, 0.0  ;;  %v1060_v21 = vld [vmem:[%s2063_s9 + $0x8] sm:$0xff] }
 0x1c5   : > { %v897_v22 = vpop.f32.mrf.mxu0 }
 0x1c6   : > { %v898_v38 = vadd.f32 %v897_v22, %v800_v33  ;;  %v915_v46 = vmax.f32 %v894_v40, 0.0  ;;  %v1061_v22 = vld [vmem:[%s2063_s9 + $0x10] sm:$0xff] }
 0x1c7   : > { %v899_v23 = vpop.f32.mrf.mxu0 }
 0x1c8   : > { %v900_v35 = vadd.f32 %v899_v23, %v800_v33  ;;  %v916_v45 = vmax.f32 %v898_v38, 0.0  ;;  %v1062_v23 = vld [vmem:[%s2063_s9 + $0x18] sm:$0x3] }
 0x1c9   : > { %v903_v24 = vpop.f32.mrf.mxu0 }
 0x1ca   : > { %v904_v34 = vadd.f32 %v903_v24, %v805_v27  ;;  %v917_v44 = vmax.f32 %v900_v35, 0.0  ;;  %v1197_v24 = vld [vmem:[%s2066_s12] sm:$0x7] }
 0x1cb   : > { %v905_v26 = vpop.f32.mrf.mxu0 }
 0x1cc   : > { %v906_v31 = vadd.f32 %v905_v26, %v805_v27  ;;  %v918_v43 = vmax.f32 %v904_v34, 0.0 }
 0x1cd   : > { %v909_v28 = vpop.f32.mrf.mxu0 }
 0x1ce   : > { %v910_v29 = vadd.f32 %v909_v28, %v810_v25  ;;  %v919_v41 = vmax.f32 %v906_v31, 0.0 }
 0x1cf   : > { %v911_v30 = vpop.f32.mrf.mxu0 }
 0x1d0   : > { %v912_v32 = vadd.f32 %v911_v30, %v810_v25  ;;  %v920_v39 = vmax.f32 %v910_v29, 0.0  ;;  %v1085_v30 = vpop.permute.xlu0 %1084 }
 0x1d2   : > { %v921_v36 = vmax.f32 %v912_v32, 0.0  ;;  %v1080_v32 = vpop.permute.xlu1 %1079 }
 0x1d4   : > { %986 = vmatprep.subr.mxu1 %v921_v36  ;;  %v1075_v38 = vpop.permute.xlu0 %1074 }
 0x1d5   : > { %987 = vmatpush1.msra.mxu1 %v920_v39 }
 0x1d6   : > { %988 = vmatprep.subr.mxu1 %v919_v41  ;;  %v1070_v42 = vpop.permute.xlu1 %1069 }
 0x1d7   : > { %989 = vmatpush1.msra.mxu1 %v918_v43 }
 0x1d8   : > { %990 = vmatprep.subr.mxu1 %v917_v44 }
 0x1d9   : > { %991 = vmatpush1.msra.mxu1 %v916_v45 }
 0x1da   : > { %992 = vmatprep.subr.mxu1 %v915_v46 }
 0x1db   : > { %993 = vmatpush1.msra.mxu1 %v914_v47 }
 0x1dc   : > { %1558 = vmatmul.mubr.msk.f32.vlgmr.msra.gmra.mxu1 %vm812_vm2, %v922_v48  ;;  %1566 = vmatprep.subr.msk.mxu1 %vm547_vm0, %v1850_v9  ;;  %v925_v9 = vld [vmem:[%s2061_s7 + $0x18] sm:$0xff] }
 0x1dd   : > { %1032 = vmatprep.mubr.f32.mxu1 %v1688_v0  ;;  %1567 = vmatpush1.msk.msra.mxu1 %vm547_vm0, %v1842_v7 }
 0x1e0   : > { %1559 = vmatmul.mubr.msk.f32.gmra.mxu1 %vm812_vm2, %v923_v49 }
 0x1e1   : > { %1038 = vmatprep.mubr.f32.mxu1 %v1688_v0 }
 0x1e4   : > { %1560 = vmatmul.mubr.msk.f32.gmra.mxu1 %vm812_vm2, %v924_v50 }
 0x1e5   : > { %1044 = vmatprep.mubr.f32.mxu1 %v1688_v0 }
 0x1e8   : > { %1561 = vmatmul.mubr.msk.f32.gmra.mxu1 %vm812_vm2, %v925_v9 }
 0x1e9   : > { %1267 = vmatprep.mubr.f32.mxu1 %v1688_v0 }
 0x1ec   : > { %1568 = vmatmul.mubr.msk.f32.vlgmr.msra.gmra.mxu1 %vm534_vm1, %v1197_v24 }
 0x1ed   : > { %1349 = vmatprep.mubr.f32.mxu1 %v1688_v0 }
 0x29c   : > { %v1028_v51 = vpop.f32.mrf.mxu1 }
 0x29d   : > { %v1029_v14 = vadd.f32 %v1028_v51, %v933_v5 }
 0x29e   : > { %v1030_v52 = vpop.f32.mrf.mxu1 }
 0x29f   : > { %v1031_v12 = vadd.f32 %v1030_v52, %v933_v5  ;;  %v1051_v19 = vmax.f32 %v1029_v14, 0.0  ;;  %v1196_v52 = vld [vmem:[%s2065_s11] sm:$0x7] }
 0x2a0   : > { %v1034_v53 = vpop.f32.mrf.mxu1 }
 0x2a1   : > { %v1035_v10 = vadd.f32 %v1034_v53, %v938_v1  ;;  %v1052_v18 = vmax.f32 %v1031_v12, 0.0  ;;  %v1198_v53 = vld [vmem:[%s2067_s13] sm:$0x7] }
 0x2a2   : > { %v1036_v54 = vpop.f32.mrf.mxu1 }
 0x2a3   : > { %v1037_v3 = vadd.f32 %v1036_v54, %v938_v1  ;;  %v1053_v17 = vmax.f32 %v1035_v10, 0.0 }
 0x2a4   : > { %v1040_v55 = vpop.f32.mrf.mxu1 }
 0x2a5   : > { %v1041_v2 = vadd.f32 %v1040_v55, %v943_v58  ;;  %v1054_v16 = vmax.f32 %v1037_v3, 0.0 }
 0x2a6   : > { %v1042_v57 = vpop.f32.mrf.mxu1 }
 0x2a7   : > { %v1043_v62 = vadd.f32 %v1042_v57, %v943_v58  ;;  %v1055_v15 = vmax.f32 %v1041_v2, 0.0 }
 0x2a8   : > { %v1046_v59 = vpop.f32.mrf.mxu1 }
 0x2a9   : > { %v1047_v60 = vadd.f32 %v1046_v59, %v948_v56  ;;  %v1056_v13 = vmax.f32 %v1043_v62, 0.0 }
 0x2aa   : > { %v1048_v61 = vpop.f32.mrf.mxu1 }
 0x2ab   : > { %v1049_v63 = vadd.f32 %v1048_v61, %v948_v56  ;;  %v1057_v11 = vmax.f32 %v1047_v60, 0.0 }
 0x2ac   : > { %v1269_v54 = vpop.f32.mrf.mxu1 }
 0x2ad   : > { %v1058_v4 = vmax.f32 %v1049_v63, 0.0  ;;  %v1437_v63 = vpop.permute.xlu0 %1436 }
 0x2ae   : > { %v1271_v55 = vpop.f32.mrf.mxu1 }
 0x2af   : > { %1123 = vmatprep.subr.mxu0 %v1058_v4 }
 0x2b0   : > { %1124 = vmatpush1.msra.mxu0 %v1057_v11 }
 0x2b1   : > { %1125 = vmatprep.subr.mxu0 %v1056_v13 }
 0x2b2   : > { %1126 = vmatpush1.msra.mxu0 %v1055_v15 }
 0x2b3   : > { %1127 = vmatprep.subr.mxu0 %v1054_v16 }
 0x2b4   : > { %1128 = vmatpush1.msra.mxu0 %v1053_v17 }
 0x2b5   : > { %1129 = vmatprep.subr.mxu0 %v1052_v18 }
 0x2b6   : > { %1130 = vmatpush1.msra.mxu0 %v1051_v19 }
 0x2b7   : > { %1562 = vmatmul.mubr.msk.f32.vlgmr.msra.gmra.mxu0 %vm812_vm2, %v1059_v20 }
 0x2b8   : > { %1169 = vmatprep.mubr.f32.mxu0 %v1688_v0 }
 0x2bb   : > { %1563 = vmatmul.mubr.msk.f32.gmra.mxu0 %vm812_vm2, %v1060_v21 }
 0x2bc   : > { %1175 = vmatprep.mubr.f32.mxu0 %v1688_v0 }
 0x2bf   : > { %1564 = vmatmul.mubr.msk.f32.gmra.mxu0 %vm812_vm2, %v1061_v22 }
 0x2c0   : > { %1181 = vmatprep.mubr.f32.mxu0 %v1688_v0 }
 0x2c3   : > { %1565 = vmatmul.mubr.msk.f32.gmra.mxu0 %vm812_vm2, %v1062_v23 }
 0x377   : > { %v1165_v25 = vpop.f32.mrf.mxu0 }
 0x378   : > { %v1166_v47 = vadd.f32 %v1165_v25, %v1070_v42 }
 0x379   : > { %v1167_v26 = vpop.f32.mrf.mxu0 }
 0x37a   : > { %v1168_v45 = vadd.f32 %v1167_v26, %v1070_v42  ;;  %v1188_v51 = vmax.f32 %v1166_v47, 0.0 }
 0x37b   : > { %v1171_v27 = vpop.f32.mrf.mxu0 }
 0x37c   : > { %v1172_v43 = vadd.f32 %v1171_v27, %v1075_v38  ;;  %v1189_v9 = vmax.f32 %v1168_v45, 0.0 }
 0x37d   : > { %v1173_v28 = vpop.f32.mrf.mxu0 }
 0x37e   : > { %v1174_v40 = vadd.f32 %v1173_v28, %v1075_v38  ;;  %v1190_v50 = vmax.f32 %v1172_v43, 0.0 }
 0x37f   : > { %v1177_v29 = vpop.f32.mrf.mxu0 }
 0x380   : > { %v1178_v39 = vadd.f32 %v1177_v29, %v1080_v32  ;;  %v1191_v49 = vmax.f32 %v1174_v40, 0.0 }
 0x381   : > { %v1179_v31 = vpop.f32.mrf.mxu0 }
 0x382   : > { %v1180_v36 = vadd.f32 %v1179_v31, %v1080_v32  ;;  %v1192_v48 = vmax.f32 %v1178_v39, 0.0 }
 0x383   : > { %v1183_v33 = vpop.f32.mrf.mxu0 }
 0x384   : > { %v1184_v34 = vadd.f32 %v1183_v33, %v1085_v30  ;;  %v1193_v46 = vmax.f32 %v1180_v36, 0.0 }
 0x385   : > { %v1185_v35 = vpop.f32.mrf.mxu0 }
 0x386   : > { %v1186_v37 = vadd.f32 %v1185_v35, %v1085_v30  ;;  %v1194_v44 = vmax.f32 %v1184_v34, 0.0 }
 0x388   : > { %v1195_v41 = vmax.f32 %v1186_v37, 0.0 }
 0x38a   : > { %1569 = vmatprep.subr.msk.mxu1 %vm1278_vm3, %v1195_v41 }
 0x38b   : > { %1570 = vmatpush1.msk.msra.mxu1 %vm1278_vm3, %v1194_v44 }
 0x38c   : > { %1311 = vmatprep.subr.mxu1 %v1193_v46 }
 0x38d   : > { %1312 = vmatpush1.msra.mxu1 %v1192_v48 }
 0x38e   : > { %1313 = vmatprep.subr.mxu1 %v1191_v49 }
 0x38f   : > { %1314 = vmatpush1.msra.mxu1 %v1190_v50 }
 0x390   : > { %1315 = vmatprep.subr.mxu1 %v1189_v9 }
 0x391   : > { %1316 = vmatpush1.msra.mxu1 %v1188_v51 }
 0x392   : > { %1571 = vmatmul.mubr.msk.f32.vlgmr.msra.gmra.mxu1 %vm1274_vm4, %v1196_v52  ;;  %1572 = vmatprep.subr.msk.mxu1 %vm547_vm0, %v1846_v8 }
 0x393   : > { %1573 = vmatpush1.msk.msra.mxu1 %vm547_vm0, %v1840_v6  ;;  %1423 = vmatprep.mubr.f32.mxu1 %v1688_v0 }
 0x396   : > { %1574 = vmatmul.mubr.msk.f32.vlgmr.msra.gmra.mxu1 %vm534_vm1, %v1198_v53 }
 0x452   : > { %v1351_v56 = vpop.f32.mrf.mxu1 }
 0x453   : > { %v1352_v58 = vadd.f32 %v1351_v56, %v1269_v54 }
 0x454   : > { %v1353_v57 = vpop.f32.mrf.mxu1 }
 0x455   : > { %v1354_v8 = vadd.f32 %v1353_v57, %v1271_v55 }
 0x456   : > { %v1425_v59 = vpop.f32.mrf.mxu1 }
 0x457   : > { %v1430_v60 = vadd.f32 %v1425_v59, %v1352_v58 }
 0x458   : > { %v1427_v61 = vpop.f32.mrf.mxu1 }
 0x459   : > { %v1432_v6 = vmul.f32 0.70710677, %v1430_v60  ;;  %v1431_v0 = vadd.f32 %v1427_v61, %v1354_v8 }
 0x45b   : > { %v1433_v62 = vmul.f32 0.70710677, %v1431_v0  ;;  %v1439_v1 = vadd.f32 %v1437_v63, %v1432_v6 }
 0x45d   : > { %v1440_v2 = vadd.f32 %v1437_v63, %v1433_v62 }
 0x45f   : > { %v1443_v3 = vcombine.low %v1439_v1, %v1440_v2 }
 0x461   : > { %v1445_v4 = vadd.f32 %v1443_v3, %v1842_v7 }
 0x463   : > { %1446 = vst [vmem:[%s504_s28] sm:$0x77] %v1445_v4 }
 0x464   : > { %1639 = shalt.err (!%p1636_p3)
}
 0x465   : > { %s1640_s18 = scalar_lea.hbm %s1460_s26, 128  ;;  %s1644_s28 = scalar_lea.hbm %s2090_s25, 512 }
 0x466   : > { %p1641_p4 = scmp.ne.s32.totalorder %s1460_s26, %s1640_s18  ;;  %p1645_p9 = scmp.lt.s32.totalorder %s1460_s26, %s2090_s25 }
 0x467   : > { %p1646_p10 = scmp.lt.s32.totalorder %s1644_s28, %s1640_s18 }
 0x468   : > { %p1642_p7 = pnand %p1641_p4, %p1809_p5 }
 0x469   : > { %p1647_p11 = por %p1646_p10, %p1645_p9 }
 0x46a   : > { %p1643_p8 = pneg %p1642_p7 }
 0x46c   : > { %p1648_p12 = pnand %p1647_p11, %p1643_p8 }
 0x46e   : > { %1651 = shalt.err (!%p1648_p12)
}
 0x46f   : > { %1581 = dma.vmem_to_hbm [thread:$0]  (%p1809_p5), %s1463_s29, 128, %s1460_s26, %s1448_s16  }
 0x470 PF: > { %s2091_s17 = sld [smem:[#allocation7_spill]] }
 0x471   : > { %s2092_s15 = sld [smem:[#allocation5_spill]] }
 0x476   : > { %p1587_p13 = scmp.ge.s32.totalorder %s2091_s17, 2 }
 0x477   : > { %s1474_s22 = sand.u32 1, %s2092_s15  }
 0x478   : > { %p1584_p0 = pnand %p1587_p13, %p1813_p6  ;;  %s1475_s21 = scalar_lea.sflag [#allocation3], %s1474_s22 }
 0x47a   : > { %p1585_p1 = pneg %p1584_p0 }
 0x47c   : > { %1669 = dma.done.wait (%p1585_p1), %s1475_s21, 128  }
 0x47d   : > { %1671 = vsyncadd (%p1585_p1), %s1475_s21, 4294967168  ;;  %s2094_s21 = sld [smem:[#allocation8_spill]]  ;;  %s2097_s18 = smov %s1678_s19 }
 0x47e   : > { %s2095_s27 = sld [smem:[#allocation6_spill]] }
 0x47f   : > { %s2096_s20 = sld [smem:[#allocation9_spill]] }
 0x483   : > { %p25_p2 = scmp.ge.s32.totalorder %s2094_s21, 6  }
 0x484   : > { %s2098_s19 = smov %s2095_s27 }
 0x485   :  { %27 = sbr.rel (!%p25_p2) target bundleno = 5 (0x5), region = 118 }
 0x48a   :  { %1480 = vsyncpa [#allocation3], 1 }
 0x48b   :  { %1482 = vsyncpa [#allocation3 + $0x1], 1 }

</bundles_post_ra>
